<compile_context>
chip_gen: v5e
topology: v5e:2x2
jax: 0.10.0
libtpu: 0.0.40
codegen_flags: <defaults>
</compile_context>

<pallas_src>
import jax
import jax.numpy as jnp
from jax.experimental import pallas as pl
from jax.experimental.pallas import tpu as pltpu

n_embed = 256
num_heads = 4
head_size = n_embed // num_heads
ctx_len = 256
# TODO(synk): dropout (p=0.25) is a training-time op; implemented as identity (eval mode).


def fused_mha_kernel(x_ref, wqkv_ref, wproj_ref, b_ref, o_ref):
    # x_ref    : (1, T, C)   one batch element
    # wqkv_ref : (C, 3C)     packed [Wq | Wk | Wv], each (C, H*hs)
    # wproj_ref: (C, C)
    # b_ref    : (1, C)
    # o_ref    : (1, T, C)   lane-dense output block
    x = x_ref[0]                                   # (T, C)
    in_dt = x.dtype
    T = x.shape[0]

    # Fused QKV projection: one wide matmul, f32 accumulation.
    qkv = jnp.dot(x, wqkv_ref[...], preferred_element_type=jnp.float32)  # (T, 3C)

    # Causal mask built once, shared by all heads.
    row = jax.lax.broadcasted_iota(jnp.int32, (T, T), 0)
    col = jax.lax.broadcasted_iota(jnp.int32, (T, T), 1)
    causal = col <= row

    scale = head_size ** -0.5
    head_outs = []
    for h in range(num_heads):                     # unrolled, H=4
        q = (qkv[:, h * head_size:(h + 1) * head_size] * scale).astype(in_dt)
        k = qkv[:, n_embed + h * head_size: n_embed + (h + 1) * head_size].astype(in_dt)
        v = qkv[:, 2 * n_embed + h * head_size: 2 * n_embed + (h + 1) * head_size].astype(in_dt)

        # scores: contract the last dims of q and k directly (no k.T temp)
        s = jax.lax.dot_general(q, k, (((1,), (1,)), ((), ())),
                                preferred_element_type=jnp.float32)      # (T, T)
        s = jnp.where(causal, s, -jnp.inf)

        # numerically stable softmax; divide moved onto the EUP
        m = jnp.max(s, axis=-1, keepdims=True)
        p = jnp.exp(s - m)
        denom = jnp.sum(p, axis=-1, keepdims=True)
        p = p * pl.reciprocal(denom, approx=True)

        head_outs.append(
            jnp.dot(p.astype(in_dt), v, preferred_element_type=jnp.float32))  # (T, hs)

    cat = jnp.concatenate(head_outs, axis=-1)       # (T, C) in VMEM
    y = jnp.dot(cat.astype(in_dt), wproj_ref[...],
                preferred_element_type=jnp.float32)
    y = y + b_ref[...].astype(jnp.float32)          # (1, C) broadcasts over rows
    o_ref[0] = y.astype(o_ref.dtype)


def _pack_qkv(wq, wk, wv):
    """(H, C, hs) per-head weights -> (C, 3*H*hs) packed [Wq | Wk | Wv]."""
    H, C, hs = wq.shape
    to_mat = lambda w: jnp.transpose(w, (1, 0, 2)).reshape(C, H * hs)
    return jnp.concatenate([to_mat(wq), to_mat(wk), to_mat(wv)], axis=-1)


def multi_head_attention(x, wq, wk, wv, w_proj, b_proj):
    """x: (B, T, C); wq/wk/wv: (H, C, hs); w_proj: (C, C); b_proj: (1, C)."""
    B, T, C = x.shape
    H, _, hs = wq.shape
    assert C == n_embed and H == num_heads and hs == head_size
    assert T <= ctx_len
    assert T % 8 == 0, "T must be a multiple of 8 for TPU sublane tiling"

    w_qkv = _pack_qkv(wq, wk, wv).astype(x.dtype)    # (C, 3C), one-time glue
    w_proj = w_proj.astype(x.dtype)
    b_proj = b_proj.astype(x.dtype)

    # TODO(synk): for B == 1 on v7x (2 TensorCores), add a query-tile grid axis
    # so both cores get work; at B >= 2 the batch axis already parallelizes.
    out = pl.pallas_call(
        fused_mha_kernel,
        out_shape=jax.ShapeDtypeStruct((B, T, C), x.dtype),
        grid=(B,),
        in_specs=[
            pl.BlockSpec((1, T, C), lambda b: (b, 0, 0)),
            pl.BlockSpec((C, 3 * C), lambda b: (0, 0)),
            pl.BlockSpec((C, C), lambda b: (0, 0)),
            pl.BlockSpec((1, C), lambda b: (0, 0)),
        ],
        out_specs=pl.BlockSpec((1, T, C), lambda b: (b, 0, 0)),
        compiler_params=pltpu.CompilerParams(
            dimension_semantics=("parallel",)),
    )(x, w_qkv, w_proj, b_proj)

    return out


def reference(x, wq, wk, wv, w_proj, b_proj):
    """Pure-JAX reference mirroring the PyTorch forward (dropout = identity)."""
    B, T, C = x.shape
    outs = []
    for h in range(num_heads):
        q = x @ wq[h]
        k = x @ wk[h]
        v = x @ wv[h]
        wei = jnp.einsum("btd,bsd->bts", q, k) * (head_size ** -0.5)
        mask = jnp.tril(jnp.ones((T, T), dtype=bool))
        wei = jnp.where(mask, wei, -jnp.inf)
        wei = jax.nn.softmax(wei, axis=-1)
        outs.append(jnp.einsum("bts,bsd->btd", wei, v))
    cat = jnp.concatenate(outs, axis=-1)
    return cat @ w_proj + b_proj[0]


if __name__ == "__main__":
    key = jax.random.PRNGKey(0)
    k_x, k_q, k_k, k_v, k_p, k_b = jax.random.split(key, 6)

    B, T, C = 2, 8, n_embed   # small seq, embed fixed by the module definition
    x = jax.random.normal(k_x, (B, T, C), dtype=jnp.float32)

    # deterministic synthetic parameters (shapes from the module __init__)
    wq = jax.random.normal(k_q, (num_heads, C, head_size), dtype=jnp.float32) * 0.02
    wk = jax.random.normal(k_k, (num_heads, C, head_size), dtype=jnp.float32) * 0.02
    wv = jax.random.normal(k_v, (num_heads, C, head_size), dtype=jnp.float32) * 0.02
    w_proj = jax.random.normal(k_p, (C, C), dtype=jnp.float32) * 0.02
    b_proj = jax.random.normal(k_b, (1, C), dtype=jnp.float32) * 0.02

    out = multi_head_attention(x, wq, wk, wv, w_proj, b_proj)
    out = jax.block_until_ready(out)

    ref = reference(x, wq, wk, wv, w_proj, b_proj)
    assert out.shape == (B, T, C)
    # tolerance covers the EUP approximate-reciprocal softmax denominator
    assert jnp.allclose(out, ref, atol=2e-3, rtol=2e-3)

    print("KERNEL_OK")
</pallas_src>

<mosaic_0001>
module attributes {stable_mosaic.version = 11 : i64} {
  func.func @fused_mha_kernel(%arg0: i32, %arg1: memref<1x8x256xf32, #tpu.memory_space<vmem>>, %arg2: memref<256x768xf32, #tpu.memory_space<vmem>>, %arg3: memref<256x256xf32, #tpu.memory_space<vmem>>, %arg4: memref<1x256xf32, #tpu.memory_space<vmem>>, %arg5: memref<1x8x256xf32, #tpu.memory_space<vmem>>) attributes {dimension_semantics = [#tpu.dimension_semantics<parallel>], iteration_bounds = array<i64: 2>, scalar_prefetch = 0 : i64, scratch_operands = 0 : i64, tpu.core_type = #tpu.core_type<tc>, window_params = [{transform_indices = @transform_0, window_bounds = array<i64: 1, 8, 256>}, {pipeline_mode = #tpu.pipeline_mode<synchronous>, transform_indices = @transform_1, window_bounds = array<i64: 256, 768>}, {pipeline_mode = #tpu.pipeline_mode<synchronous>, transform_indices = @transform_2, window_bounds = array<i64: 256, 256>}, {pipeline_mode = #tpu.pipeline_mode<synchronous>, transform_indices = @transform_3, window_bounds = array<i64: 1, 256>}, {transform_indices = @transform_4, window_bounds = array<i64: 1, 8, 256>}]} {
    %c0 = arith.constant 0 : index
    %c0_0 = arith.constant 0 : index
    %c0_1 = arith.constant 0 : index
    %0 = vector.load %arg1[%c0, %c0_0, %c0_1] : memref<1x8x256xf32, #tpu.memory_space<vmem>>, vector<1x8x256xf32>
    %1 = vector.shape_cast %0 : vector<1x8x256xf32> to vector<8x256xf32>
    %c0_2 = arith.constant 0 : index
    %c0_3 = arith.constant 0 : index
    %2 = vector.load %arg2[%c0_2, %c0_3] : memref<256x768xf32, #tpu.memory_space<vmem>>, vector<256x768xf32>
    %cst = arith.constant dense<0.000000e+00> : vector<8x768xf32>
    %3 = tpu.matmul %1, %2, %cst {dimension_numbers = #tpu.dot_dimension_numbers<[1], [0], [0], [1], [0, 0, 1, 1], [], []>} : vector<8x256xf32>, vector<256x768xf32>, vector<8x768xf32> -> vector<8x768xf32>
    %4 = tpu.iota {dimensions = array<i32: 0>} : vector<8x8xi32>
    %5 = tpu.iota {dimensions = array<i32: 1>} : vector<8x8xi32>
    %6 = arith.cmpi sle, %5, %4 : vector<8x8xi32>
    %7 = vector.extract_strided_slice %3 {offsets = [0, 0], sizes = [8, 64], strides = [1, 1]} : vector<8x768xf32> to vector<8x64xf32>
    %cst_4 = arith.constant 1.250000e-01 : f32
    %8 = vector.broadcast %cst_4 : f32 to vector<8x64xf32>
    %9 = arith.mulf %7, %8 : vector<8x64xf32>
    %10 = vector.extract_strided_slice %3 {offsets = [0, 256], sizes = [8, 64], strides = [1, 1]} : vector<8x768xf32> to vector<8x64xf32>
    %11 = vector.extract_strided_slice %3 {offsets = [0, 512], sizes = [8, 64], strides = [1, 1]} : vector<8x768xf32> to vector<8x64xf32>
    %cst_5 = arith.constant dense<0.000000e+00> : vector<8x8xf32>
    %12 = tpu.matmul %9, %10, %cst_5 {dimension_numbers = #tpu.dot_dimension_numbers<[1], [1], [0], [0], [0, 0, 1, 0], [], []>} : vector<8x64xf32>, vector<8x64xf32>, vector<8x8xf32> -> vector<8x8xf32>
    %cst_6 = arith.constant 0xFF800000 : f32
    %13 = vector.broadcast %cst_6 : f32 to vector<8x8xf32>
    %14 = arith.select %6, %12, %13 : vector<8x8xi1>, vector<8x8xf32>
    %cst_7 = arith.constant dense<0xFF800000> : vector<8xf32>
    %15 = vector.multi_reduction <maximumf>, %14, %cst_7 [1] : vector<8x8xf32> to vector<8xf32>
    %16 = vector.shape_cast %15 : vector<8xf32> to vector<8x1xf32>
    %17 = vector.broadcast %16 : vector<8x1xf32> to vector<8x8xf32>
    %18 = arith.subf %14, %17 : vector<8x8xf32>
    %19 = math.exp %18 : vector<8x8xf32>
    %cst_8 = arith.constant dense<0.000000e+00> : vector<8xf32>
    %20 = vector.multi_reduction <add>, %19, %cst_8 [1] : vector<8x8xf32> to vector<8xf32>
    %21 = vector.shape_cast %20 : vector<8xf32> to vector<8x1xf32>
    %22 = tpu.reciprocal %21 {approx = true} : vector<8x1xf32> -> vector<8x1xf32>
    %23 = vector.broadcast %22 : vector<8x1xf32> to vector<8x8xf32>
    %24 = arith.mulf %19, %23 : vector<8x8xf32>
    %cst_9 = arith.constant dense<0.000000e+00> : vector<8x64xf32>
    %25 = tpu.matmul %24, %11, %cst_9 {dimension_numbers = #tpu.dot_dimension_numbers<[1], [0], [0], [1], [0, 0, 1, 1], [], []>} : vector<8x8xf32>, vector<8x64xf32>, vector<8x64xf32> -> vector<8x64xf32>
    %26 = vector.extract_strided_slice %3 {offsets = [0, 64], sizes = [8, 64], strides = [1, 1]} : vector<8x768xf32> to vector<8x64xf32>
    %cst_10 = arith.constant 1.250000e-01 : f32
    %27 = vector.broadcast %cst_10 : f32 to vector<8x64xf32>
    %28 = arith.mulf %26, %27 : vector<8x64xf32>
    %29 = vector.extract_strided_slice %3 {offsets = [0, 320], sizes = [8, 64], strides = [1, 1]} : vector<8x768xf32> to vector<8x64xf32>
    %30 = vector.extract_strided_slice %3 {offsets = [0, 576], sizes = [8, 64], strides = [1, 1]} : vector<8x768xf32> to vector<8x64xf32>
    %cst_11 = arith.constant dense<0.000000e+00> : vector<8x8xf32>
    %31 = tpu.matmul %28, %29, %cst_11 {dimension_numbers = #tpu.dot_dimension_numbers<[1], [1], [0], [0], [0, 0, 1, 0], [], []>} : vector<8x64xf32>, vector<8x64xf32>, vector<8x8xf32> -> vector<8x8xf32>
    %cst_12 = arith.constant 0xFF800000 : f32
    %32 = vector.broadcast %cst_12 : f32 to vector<8x8xf32>
    %33 = arith.select %6, %31, %32 : vector<8x8xi1>, vector<8x8xf32>
    %cst_13 = arith.constant dense<0xFF800000> : vector<8xf32>
    %34 = vector.multi_reduction <maximumf>, %33, %cst_13 [1] : vector<8x8xf32> to vector<8xf32>
    %35 = vector.shape_cast %34 : vector<8xf32> to vector<8x1xf32>
    %36 = vector.broadcast %35 : vector<8x1xf32> to vector<8x8xf32>
    %37 = arith.subf %33, %36 : vector<8x8xf32>
    %38 = math.exp %37 : vector<8x8xf32>
    %cst_14 = arith.constant dense<0.000000e+00> : vector<8xf32>
    %39 = vector.multi_reduction <add>, %38, %cst_14 [1] : vector<8x8xf32> to vector<8xf32>
    %40 = vector.shape_cast %39 : vector<8xf32> to vector<8x1xf32>
    %41 = tpu.reciprocal %40 {approx = true} : vector<8x1xf32> -> vector<8x1xf32>
    %42 = vector.broadcast %41 : vector<8x1xf32> to vector<8x8xf32>
    %43 = arith.mulf %38, %42 : vector<8x8xf32>
    %cst_15 = arith.constant dense<0.000000e+00> : vector<8x64xf32>
    %44 = tpu.matmul %43, %30, %cst_15 {dimension_numbers = #tpu.dot_dimension_numbers<[1], [0], [0], [1], [0, 0, 1, 1], [], []>} : vector<8x8xf32>, vector<8x64xf32>, vector<8x64xf32> -> vector<8x64xf32>
    %45 = vector.extract_strided_slice %3 {offsets = [0, 128], sizes = [8, 64], strides = [1, 1]} : vector<8x768xf32> to vector<8x64xf32>
    %cst_16 = arith.constant 1.250000e-01 : f32
    %46 = vector.broadcast %cst_16 : f32 to vector<8x64xf32>
    %47 = arith.mulf %45, %46 : vector<8x64xf32>
    %48 = vector.extract_strided_slice %3 {offsets = [0, 384], sizes = [8, 64], strides = [1, 1]} : vector<8x768xf32> to vector<8x64xf32>
    %49 = vector.extract_strided_slice %3 {offsets = [0, 640], sizes = [8, 64], strides = [1, 1]} : vector<8x768xf32> to vector<8x64xf32>
    %cst_17 = arith.constant dense<0.000000e+00> : vector<8x8xf32>
    %50 = tpu.matmul %47, %48, %cst_17 {dimension_numbers = #tpu.dot_dimension_numbers<[1], [1], [0], [0], [0, 0, 1, 0], [], []>} : vector<8x64xf32>, vector<8x64xf32>, vector<8x8xf32> -> vector<8x8xf32>
    %cst_18 = arith.constant 0xFF800000 : f32
    %51 = vector.broadcast %cst_18 : f32 to vector<8x8xf32>
    %52 = arith.select %6, %50, %51 : vector<8x8xi1>, vector<8x8xf32>
    %cst_19 = arith.constant dense<0xFF800000> : vector<8xf32>
    %53 = vector.multi_reduction <maximumf>, %52, %cst_19 [1] : vector<8x8xf32> to vector<8xf32>
    %54 = vector.shape_cast %53 : vector<8xf32> to vector<8x1xf32>
    %55 = vector.broadcast %54 : vector<8x1xf32> to vector<8x8xf32>
    %56 = arith.subf %52, %55 : vector<8x8xf32>
    %57 = math.exp %56 : vector<8x8xf32>
    %cst_20 = arith.constant dense<0.000000e+00> : vector<8xf32>
    %58 = vector.multi_reduction <add>, %57, %cst_20 [1] : vector<8x8xf32> to vector<8xf32>
    %59 = vector.shape_cast %58 : vector<8xf32> to vector<8x1xf32>
    %60 = tpu.reciprocal %59 {approx = true} : vector<8x1xf32> -> vector<8x1xf32>
    %61 = vector.broadcast %60 : vector<8x1xf32> to vector<8x8xf32>
    %62 = arith.mulf %57, %61 : vector<8x8xf32>
    %cst_21 = arith.constant dense<0.000000e+00> : vector<8x64xf32>
    %63 = tpu.matmul %62, %49, %cst_21 {dimension_numbers = #tpu.dot_dimension_numbers<[1], [0], [0], [1], [0, 0, 1, 1], [], []>} : vector<8x8xf32>, vector<8x64xf32>, vector<8x64xf32> -> vector<8x64xf32>
    %64 = vector.extract_strided_slice %3 {offsets = [0, 192], sizes = [8, 64], strides = [1, 1]} : vector<8x768xf32> to vector<8x64xf32>
    %cst_22 = arith.constant 1.250000e-01 : f32
    %65 = vector.broadcast %cst_22 : f32 to vector<8x64xf32>
    %66 = arith.mulf %64, %65 : vector<8x64xf32>
    %67 = vector.extract_strided_slice %3 {offsets = [0, 448], sizes = [8, 64], strides = [1, 1]} : vector<8x768xf32> to vector<8x64xf32>
    %68 = vector.extract_strided_slice %3 {offsets = [0, 704], sizes = [8, 64], strides = [1, 1]} : vector<8x768xf32> to vector<8x64xf32>
    %cst_23 = arith.constant dense<0.000000e+00> : vector<8x8xf32>
    %69 = tpu.matmul %66, %67, %cst_23 {dimension_numbers = #tpu.dot_dimension_numbers<[1], [1], [0], [0], [0, 0, 1, 0], [], []>} : vector<8x64xf32>, vector<8x64xf32>, vector<8x8xf32> -> vector<8x8xf32>
    %cst_24 = arith.constant 0xFF800000 : f32
    %70 = vector.broadcast %cst_24 : f32 to vector<8x8xf32>
    %71 = arith.select %6, %69, %70 : vector<8x8xi1>, vector<8x8xf32>
    %cst_25 = arith.constant dense<0xFF800000> : vector<8xf32>
    %72 = vector.multi_reduction <maximumf>, %71, %cst_25 [1] : vector<8x8xf32> to vector<8xf32>
    %73 = vector.shape_cast %72 : vector<8xf32> to vector<8x1xf32>
    %74 = vector.broadcast %73 : vector<8x1xf32> to vector<8x8xf32>
    %75 = arith.subf %71, %74 : vector<8x8xf32>
    %76 = math.exp %75 : vector<8x8xf32>
    %cst_26 = arith.constant dense<0.000000e+00> : vector<8xf32>
    %77 = vector.multi_reduction <add>, %76, %cst_26 [1] : vector<8x8xf32> to vector<8xf32>
    %78 = vector.shape_cast %77 : vector<8xf32> to vector<8x1xf32>
    %79 = tpu.reciprocal %78 {approx = true} : vector<8x1xf32> -> vector<8x1xf32>
    %80 = vector.broadcast %79 : vector<8x1xf32> to vector<8x8xf32>
    %81 = arith.mulf %76, %80 : vector<8x8xf32>
    %cst_27 = arith.constant dense<0.000000e+00> : vector<8x64xf32>
    %82 = tpu.matmul %81, %68, %cst_27 {dimension_numbers = #tpu.dot_dimension_numbers<[1], [0], [0], [1], [0, 0, 1, 1], [], []>} : vector<8x8xf32>, vector<8x64xf32>, vector<8x64xf32> -> vector<8x64xf32>
    %83 = tpu.concatenate %25, %44, %63, %82 in 1 : vector<8x64xf32>, vector<8x64xf32>, vector<8x64xf32>, vector<8x64xf32> -> vector<8x256xf32>
    %c0_28 = arith.constant 0 : index
    %c0_29 = arith.constant 0 : index
    %84 = vector.load %arg3[%c0_28, %c0_29] : memref<256x256xf32, #tpu.memory_space<vmem>>, vector<256x256xf32>
    %cst_30 = arith.constant dense<0.000000e+00> : vector<8x256xf32>
    %85 = tpu.matmul %83, %84, %cst_30 {dimension_numbers = #tpu.dot_dimension_numbers<[1], [0], [0], [1], [0, 0, 1, 1], [], []>} : vector<8x256xf32>, vector<256x256xf32>, vector<8x256xf32> -> vector<8x256xf32>
    %c0_31 = arith.constant 0 : index
    %c0_32 = arith.constant 0 : index
    %86 = vector.load %arg4[%c0_31, %c0_32] : memref<1x256xf32, #tpu.memory_space<vmem>>, vector<1x256xf32>
    %87 = vector.broadcast %86 : vector<1x256xf32> to vector<8x256xf32>
    %88 = arith.addf %85, %87 : vector<8x256xf32>
    %c0_33 = arith.constant 0 : index
    %c0_34 = arith.constant 0 : index
    %c0_35 = arith.constant 0 : index
    %89 = vector.load %arg5[%c0_33, %c0_34, %c0_35] : memref<1x8x256xf32, #tpu.memory_space<vmem>>, vector<1x8x256xf32>
    %90 = vector.shape_cast %89 : vector<1x8x256xf32> to vector<8x256xf32>
    %91 = vector.shape_cast %88 : vector<8x256xf32> to vector<1x8x256xf32>
    tpu.vector_store %arg5[%c0_33, %c0_34, %c0_35], %91 {strides = array<i32>} : memref<1x8x256xf32, #tpu.memory_space<vmem>>, vector<1x8x256xf32>,
    return
  }
  func.func @transform_0(%arg0: i32) -> (i32, i32, i32) {
    %c0_i32 = arith.constant 0 : i32
    %c0_i32_0 = arith.constant 0 : i32
    %c0_i32_1 = arith.constant 0 : i32
    return %arg0, %c0_i32, %c0_i32_0 : i32, i32, i32
  }
  func.func @transform_1(%arg0: i32) -> (i32, i32) {
    %c0_i32 = arith.constant 0 : i32
    %c0_i32_0 = arith.constant 0 : i32
    %c0_i32_1 = arith.constant 0 : i32
    return %c0_i32, %c0_i32_0 : i32, i32
  }
  func.func @transform_2(%arg0: i32) -> (i32, i32) {
    %c0_i32 = arith.constant 0 : i32
    %c0_i32_0 = arith.constant 0 : i32
    %c0_i32_1 = arith.constant 0 : i32
    return %c0_i32, %c0_i32_0 : i32, i32
  }
  func.func @transform_3(%arg0: i32) -> (i32, i32) {
    %c0_i32 = arith.constant 0 : i32
    %c0_i32_0 = arith.constant 0 : i32
    %c0_i32_1 = arith.constant 0 : i32
    return %c0_i32, %c0_i32_0 : i32, i32
  }
  func.func @transform_4(%arg0: i32) -> (i32, i32, i32) {
    %c0_i32 = arith.constant 0 : i32
    %c0_i32_0 = arith.constant 0 : i32
    %c0_i32_1 = arith.constant 0 : i32
    return %arg0, %c0_i32, %c0_i32_0 : i32, i32, i32
  }
}

</mosaic_0001>

<bundles_post_ra>
// kernel: tpu_custom_call.1
= control target key start
LH: loop header
LB: loop body
LE: loop exit
PB: predicated region body
PF: predicated region fallthrough
CT: control target
= control target key end

     0   :  { %9 = vsyncpa [#allocation3], 0  ;;  %s1740_s0 = inlined_call_operand.hbm [shape: f32[2,8,256], index: 0, kind: input, shape index: {}]   ;;  %s1741_s1 = inlined_call_operand.hbm [shape: f32[256,768], index: 1, kind: input, shape index: {}]   ;;  %s1742_s2 = inlined_call_operand.hbm [shape: f32[256,256], index: 2, kind: input, shape index: {}]   ;;  %s1743_s3 = inlined_call_operand.vmem [shape: f32[1,256], index: 3, kind: input, shape index: {}]   ;;  %s1744_s4 = inlined_call_operand.hbm [shape: f32[2,8,256], index: 4, kind: output, shape index: {}]  }
   0x1   :  { %11 = vsyncpa [#allocation3 + $0x1], 0 }
   0x2   :  { %12 = vsyncpa [#allocation6], 0 }
   0x3   :  { %13 = vsyncpa [#allocation4], 0 }
   0x4   :  { %15 = vsyncpa [#allocation4 + $0x1], 0  ;;  %s1535_s15 = smov 0   ;;  %s1537_s16 = smov 0  }
   0x5   :  { %s1539_s17 = smov 0   ;;  %s1541_s18 = smov 0  }
   0x6 LB: > { %s152_s21 = sshll.u32 %s1741_s1, 4  ;;  %s1559_s22 = sadd.s32 4294967295, %s1501_s18   ;;  %s1501_s18 = sphi %s1541_s18, %s1755_s18   ;;  %s1497_s17 = sphi %s1539_s17, %s1754_s17   ;;  %s1493_s16 = sphi %s1537_s16, %s1753_s16   ;;  %s1489_s15 = sphi %s1535_s15, %s1752_s15   ;;  %s153_s21 = int_to_ptr.hbm [resolvable:$true] %s152_s21 }
   0x7   : > { %p1217_p0 = scmp.ge.s32.totalorder %s1501_s18, 1  ;;  %p42_p1 = scmp.eq.s32.totalorder %s1559_s22, 0 }
   0x8   : > { %p141_p2 = scmp.lt.s32.totalorder %s1501_s18, 3  ;;  %s1503_s24 = smov [#allocation5]  }
   0x9   : > { %s154_s25 = sshll.u32 %s1503_s24, 4  ;;  %s166_s28 = sshll.u32 %s1742_s2, 4  ;;  %s155_s25 = int_to_ptr.vmem [resolvable:$true] %s154_s25  ;;  %s167_s28 = int_to_ptr.hbm [resolvable:$true] %s166_s28 }
   0xa   : > { %p1564_p3 = pnand %p1217_p0, %p141_p2  ;;  %s1504_s29 = smov [#allocation7]  }
   0xb   : > { %s168_s30 = sshll.u32 %s1504_s29, 4  ;;  %s1505_s5 = smov 768   ;;  %s169_s30 = int_to_ptr.vmem [resolvable:$true] %s168_s30 }
   0xc   : > { %p1260_p4 = pneg %p1564_p3  ;;  %s1506_s6 = smov 48  }
   0xd   : > { %s1507_s7 = smov 256   ;;  %s1508_s8 = smov 16  }
   0xe   : > { %p1261_p6 = pnand %p1260_p4, %p42_p1  ;;  %s1216_s9 = sadd.s32 4294967294, %s1501_s18  }
   0xf   : > { %s1578_s10 = sadd.s32 1, %s1501_s18   ;;  %s28_s12 = sadd.s32 1, %s1497_s17 }
  0x10   : > { %1263 = dma.hbm_to_vmem [thread:$0]  (!%p1261_p6), %s153_s21, 24576, %s155_s25, [#allocation6], %s1505_s5, %s1505_s5, %s1506_s6  }
  0x11   : > { %1266 = dma.hbm_to_vmem [thread:$0]  (!%p1261_p6), %s167_s28, 8192, %s169_s30, [#allocation6], %s1507_s7, %s1507_s7, %s1508_s8  }
  0x12   : > { %s25_s11 = ssub.s32 %s1501_s18, %s1578_s10  ;;  %p35_p8 = scmp.ne.s32.totalorder %s1497_s17, %s1493_s16 }
  0x13   : > { %p26_p7 = scmp.eq.s32.totalorder %s25_s11, 0  ;;  %p36_p9 = scmp.eq.s32.totalorder %s1501_s18, 0 }
  0x14   : > { %p41_p10 = scmp.ne.s32.totalorder %s1493_s16, %s1489_s15  ;;  %p128_p13 = scmp.eq.s32.totalorder %s1559_s22, 1 }
  0x15   : > { %s1589_s13 = scalar_select %p26_p7, %s1497_s17, %s28_s12  }
  0x16   : > { %p1591_p11 = por %p36_p9, %p35_p8  ;;  %p1597_p12 = por %p42_p1, %p41_p10 }
  0x17   : > { %p134_p0 = scmp.eq.s32.totalorder %s1216_s9, 1  ;;  %p1277_p2 = scmp.lt.s32.totalorder %s1501_s18, 2 }
  0x18   : > { %s185_s20 = sand.u32 1, %s1497_s17   ;;  %p1604_p4 = por %p128_p13, %p35_p8 }
  0x19   : > { %p1608_p6 = por %p134_p0, %p41_p10  ;;  %s1221_s25 = sshll.u32 %s185_s20, 4 }
  0x1a   : > { %s1246_s26 = sshll.u32 %s1501_s18, 4  ;;  %s189_s30 = scalar_lea.vmem [#allocation2], %s1221_s25 }
  0x1b   : > { %s194_s29 = scalar_lea.hbm %s1740_s0, %s1246_s26  ;;  %s198_s5 = sshll.u32 %s189_s30, 4  ;;  %s199_s5 = int_to_ptr.vmem [resolvable:$true] %s198_s5 }
  0x1c   : > { %s196_s6 = sshll.u32 %s194_s29, 4  ;;  %p1618_p7 = pnand %p1277_p2, %p1591_p11  ;;  %s197_s6 = int_to_ptr.hbm [resolvable:$true] %s196_s6 }
  0x1d   : > { %s186_s8 = scalar_lea.sflag [#allocation3], %s185_s20  ;;  %s1401_s9 = sshra.s32 %s197_s6, 4  ;;  %s1402_s9 = int_to_ptr.hbm [resolvable:$true] %s1401_s9 }
  0x1e   : > { %s1403_s11 = scalar_lea.hbm %s1402_s9, 16  ;;  %p1405_p9 = pneg %p1618_p7 }
  0x1f   : > { %p1404_p8 = scmp.ne.s32.totalorder %s1402_s9, %s1403_s11  ;;  %s1408_s26 = scalar_lea.hbm %s1740_s0, 32 }
  0x20   : > { %p1409_p11 = scmp.lt.s32.totalorder %s1402_s9, %s1740_s0  ;;  %p1410_p0 = scmp.lt.s32.totalorder %s1408_s26, %s1403_s11 }
  0x21   : > { %p1406_p10 = pnand %p1405_p9, %p1404_p8 }
  0x22   : > { %p1411_p2 = por %p1410_p0, %p1409_p11 }
  0x23   : > { %p1407_p13 = pneg %p1406_p10 }
  0x25   : > { %p1412_p5 = pnand %p1411_p2, %p1407_p13 }
  0x27   : > { %1415 = shalt.err (!%p1412_p5)
}
  0x28   : > { %1270 = dma.hbm_to_vmem [thread:$0]  (!%p1618_p7), %s197_s6, 256, %s199_s5, %s186_s8  }
  0x29   : > { %207 = sbr.rel (%p1564_p3) target bundleno = 1130 (0x46a), region = 36  ;;  %s1635_s20 = sand.u32 (!%p1564_p3), 1, %s1493_s16  }
  0x2a   : > { %s1225_s28 = sshll.u32 (!%p1564_p3), %s1635_s20, 4  ;;  %s210_s29 = scalar_lea.sflag (!%p1564_p3), [#allocation3], %s1635_s20 }
  0x2b   : > { %s1641_s30 = scalar_lea.vmem (!%p1564_p3), [#allocation2], %s1225_s28 }
  0x2e   : > { %1476 = dma.done.wait (%p1597_p12), %s210_s29, 256  }
  0x2f   : > { %1478 = vsyncadd (%p1597_p12), %s210_s29, 4294967040 }
  0x30   : > { %1480 = dma.done.wait (%p42_p1), [#allocation6], 32768  }
  0x31   : > { %1482 = vsyncadd (%p42_p1), [#allocation6], 4294934528  ;;  %v341_v0 = vld [vmem:[#allocation5 + $0x2d0] sm:$0xff]  ;;  %v342_v2 = vld [vmem:[#allocation5 + $0x2d8] sm:$0xff]  ;;  %vm689_vm0 = vcmask 523264   ;;  %s1509_s23 = smov 64  }
  0x32   : > { %v437_v1 = vld [vmem:[#allocation5 + $0x5d0] sm:$0xff]  ;;  %443 = vmatpush.msra.mxu0 %v341_v0  ;;  %v438_v3 = vld [vmem:[#allocation5 + $0x5d8] sm:$0xff]  ;;  %v335_v4 = vld [vmem:[#allocation5 + $0x2a0] sm:$0xff]  ;;  %483 = vmatpush.msra.mxu2 %v342_v2  ;;  %vm717_vm2 = vcmask 64512   ;;  %s1247_s6 = sshll.u32 %s1559_s22, 4  ;;  %s248_s11 = scalar_lea.vmem [#allocation8], %s1225_s28 }
  0x33   : > { %463 = vmatpush.msra.mxu1 %v437_v1  ;;  %v431_v5 = vld [vmem:[#allocation5 + $0x5a0] sm:$0xff]  ;;  %503 = vmatpush.msra.mxu3 %v438_v3  ;;  %v336_v6 = vld [vmem:[#allocation5 + $0x2a8] sm:$0xff]  ;;  %v329_v8 = vld [vmem:[#allocation5 + $0x270] sm:$0xff]  ;;  %s1122_s9 = scalar_lea.hbm %s1744_s4, %s1247_s6  ;;  %s1124_s12 = sshll.u32 %s248_s11, 4  ;;  %s1125_s12 = int_to_ptr.vmem [resolvable:$true] %s1124_s12 }
  0x34   : > { %v432_v7 = vld [vmem:[#allocation5 + $0x5a8] sm:$0xff]  ;;  %444 = vmatpush.msra.mxu0 %v335_v4  ;;  %v425_v9 = vld [vmem:[#allocation5 + $0x570] sm:$0xff]  ;;  %v330_v10 = vld [vmem:[#allocation5 + $0x278] sm:$0xff]  ;;  %484 = vmatpush.msra.mxu2 %v336_v6  ;;  %s1126_s25 = sshll.u32 %s1122_s9, 4  ;;  %s1111_s22 = scalar_lea.sflag [#allocation4], %s1635_s20  ;;  %s1127_s25 = int_to_ptr.hbm [resolvable:$true] %s1126_s25 }
  0x35   : > { %464 = vmatpush.msra.mxu1 %v431_v5  ;;  %v426_v11 = vld [vmem:[#allocation5 + $0x578] sm:$0xff]  ;;  %504 = vmatpush.msra.mxu3 %v432_v7  ;;  %v323_v12 = vld [vmem:[#allocation5 + $0x240] sm:$0xff]  ;;  %v324_v14 = vld [vmem:[#allocation5 + $0x248] sm:$0xff]  ;;  %s1445_s26 = sshra.s32 %s1127_s25, 4  ;;  %s1451_s29 = scalar_lea.hbm %s1744_s4, 32  ;;  %s1446_s26 = int_to_ptr.hbm [resolvable:$true] %s1445_s26 }
  0x36   : > { %v419_v13 = vld [vmem:[#allocation5 + $0x540] sm:$0xff]  ;;  %445 = vmatpush.msra.mxu0 %v329_v8  ;;  %v420_v15 = vld [vmem:[#allocation5 + $0x548] sm:$0xff]  ;;  %485 = vmatpush.msra.mxu2 %v330_v10  ;;  %v317_v16 = vld [vmem:[#allocation5 + $0x210] sm:$0xff]  ;;  %s1447_s27 = scalar_lea.hbm %s1446_s26, 16  ;;  %p1452_p12 = scmp.lt.s32.totalorder %s1446_s26, %s1744_s4 }
  0x37   : > { %465 = vmatpush.msra.mxu1 %v425_v9  ;;  %505 = vmatpush.msra.mxu3 %v426_v11  ;;  %v413_v17 = vld [vmem:[#allocation5 + $0x510] sm:$0xff]  ;;  %v318_v18 = vld [vmem:[#allocation5 + $0x218] sm:$0xff]  ;;  %v311_v20 = vld [vmem:[#allocation5 + $0x1e0] sm:$0xff]  ;;  %p1448_p1 = scmp.ne.s32.totalorder %s1446_s26, %s1447_s27  ;;  %p1453_p7 = scmp.lt.s32.totalorder %s1451_s29, %s1447_s27 }
  0x38   : > { %446 = vmatpush.msra.mxu0 %v323_v12  ;;  %v414_v19 = vld [vmem:[#allocation5 + $0x518] sm:$0xff]  ;;  %486 = vmatpush.msra.mxu2 %v324_v14  ;;  %v407_v21 = vld [vmem:[#allocation5 + $0x4e0] sm:$0xff]  ;;  %v312_v22 = vld [vmem:[#allocation5 + $0x1e8] sm:$0xff] }
  0x39   : > { %466 = vmatpush.msra.mxu1 %v419_v13  ;;  %506 = vmatpush.msra.mxu3 %v420_v15  ;;  %v408_v23 = vld [vmem:[#allocation5 + $0x4e8] sm:$0xff]  ;;  %v305_v24 = vld [vmem:[#allocation5 + $0x1b0] sm:$0xff]  ;;  %v306_v26 = vld [vmem:[#allocation5 + $0x1b8] sm:$0xff]  ;;  %p1449_p3 = pnand %p1448_p1, %p1604_p4  ;;  %p1454_p8 = por %p1453_p7, %p1452_p12 }
  0x3a   : > { %447 = vmatpush.msra.mxu0 %v317_v16  ;;  %487 = vmatpush.msra.mxu2 %v318_v18  ;;  %v401_v25 = vld [vmem:[#allocation5 + $0x4b0] sm:$0xff]  ;;  %v402_v27 = vld [vmem:[#allocation5 + $0x4b8] sm:$0xff]  ;;  %v299_v28 = vld [vmem:[#allocation5 + $0x180] sm:$0xff] }
  0x3b   : > { %467 = vmatpush.msra.mxu1 %v413_v17  ;;  %507 = vmatpush.msra.mxu3 %v414_v19  ;;  %v395_v29 = vld [vmem:[#allocation5 + $0x480] sm:$0xff]  ;;  %v300_v30 = vld [vmem:[#allocation5 + $0x188] sm:$0xff]  ;;  %v293_v32 = vld [vmem:[#allocation5 + $0x150] sm:$0xff]  ;;  %p1450_p5 = pneg %p1449_p3 }
  0x3c   : > { %448 = vmatpush.msra.mxu0 %v311_v20  ;;  %488 = vmatpush.msra.mxu2 %v312_v22  ;;  %v396_v31 = vld [vmem:[#allocation5 + $0x488] sm:$0xff]  ;;  %v389_v33 = vld [vmem:[#allocation5 + $0x450] sm:$0xff]  ;;  %v294_v34 = vld [vmem:[#allocation5 + $0x158] sm:$0xff] }
  0x3d   : > { %468 = vmatpush.msra.mxu1 %v407_v21  ;;  %508 = vmatpush.msra.mxu3 %v408_v23  ;;  %v390_v35 = vld [vmem:[#allocation5 + $0x458] sm:$0xff]  ;;  %v287_v36 = vld [vmem:[#allocation5 + $0x120] sm:$0xff]  ;;  %v288_v38 = vld [vmem:[#allocation5 + $0x128] sm:$0xff]  ;;  %p1455_p9 = pnand %p1454_p8, %p1450_p5 }
  0x3e   : > { %449 = vmatpush.msra.mxu0 %v305_v24  ;;  %489 = vmatpush.msra.mxu2 %v306_v26  ;;  %v383_v37 = vld [vmem:[#allocation5 + $0x420] sm:$0xff]  ;;  %v384_v39 = vld [vmem:[#allocation5 + $0x428] sm:$0xff]  ;;  %v281_v40 = vld [vmem:[#allocation5 + $0xf0] sm:$0xff] }
  0x3f   : > { %469 = vmatpush.msra.mxu1 %v401_v25  ;;  %509 = vmatpush.msra.mxu3 %v402_v27  ;;  %v377_v41 = vld [vmem:[#allocation5 + $0x3f0] sm:$0xff]  ;;  %v282_v42 = vld [vmem:[#allocation5 + $0xf8] sm:$0xff]  ;;  %v275_v44 = vld [vmem:[#allocation5 + $0xc0] sm:$0xff] }
  0x40   : > { %450 = vmatpush.msra.mxu0 %v299_v28  ;;  %490 = vmatpush.msra.mxu2 %v300_v30  ;;  %v378_v43 = vld [vmem:[#allocation5 + $0x3f8] sm:$0xff]  ;;  %v371_v45 = vld [vmem:[#allocation5 + $0x3c0] sm:$0xff]  ;;  %v276_v46 = vld [vmem:[#allocation5 + $0xc8] sm:$0xff] }
  0x41   : > { %470 = vmatpush.msra.mxu1 %v395_v29  ;;  %510 = vmatpush.msra.mxu3 %v396_v31  ;;  %v372_v47 = vld [vmem:[#allocation5 + $0x3c8] sm:$0xff]  ;;  %v269_v48 = vld [vmem:[#allocation5 + $0x90] sm:$0xff]  ;;  %v270_v50 = vld [vmem:[#allocation5 + $0x98] sm:$0xff] }
  0x42   : > { %451 = vmatpush.msra.mxu0 %v293_v32  ;;  %491 = vmatpush.msra.mxu2 %v294_v34  ;;  %v365_v49 = vld [vmem:[#allocation5 + $0x390] sm:$0xff]  ;;  %v366_v51 = vld [vmem:[#allocation5 + $0x398] sm:$0xff]  ;;  %v263_v52 = vld [vmem:[#allocation5 + $0x60] sm:$0xff] }
  0x43   : > { %471 = vmatpush.msra.mxu1 %v389_v33  ;;  %511 = vmatpush.msra.mxu3 %v390_v35  ;;  %v359_v53 = vld [vmem:[#allocation5 + $0x360] sm:$0xff]  ;;  %v264_v54 = vld [vmem:[#allocation5 + $0x68] sm:$0xff]  ;;  %v257_v56 = vld [vmem:[#allocation5 + $0x30] sm:$0xff] }
  0x44   : > { %452 = vmatpush.msra.mxu0 %v287_v36  ;;  %492 = vmatpush.msra.mxu2 %v288_v38  ;;  %v360_v55 = vld [vmem:[#allocation5 + $0x368] sm:$0xff]  ;;  %v353_v57 = vld [vmem:[#allocation5 + $0x330] sm:$0xff]  ;;  %v258_v58 = vld [vmem:[#allocation5 + $0x38] sm:$0xff] }
  0x45   : > { %472 = vmatpush.msra.mxu1 %v383_v37  ;;  %512 = vmatpush.msra.mxu3 %v384_v39  ;;  %v354_v59 = vld [vmem:[#allocation5 + $0x338] sm:$0xff]  ;;  %v251_v60 = vld [vmem:[#allocation5] sm:$0xff]  ;;  %v252_v62 = vld [vmem:[#allocation5 + $0x8] sm:$0xff] }
  0x46   : > { %453 = vmatpush.msra.mxu0 %v281_v40  ;;  %493 = vmatpush.msra.mxu2 %v282_v42  ;;  %v347_v61 = vld [vmem:[#allocation5 + $0x300] sm:$0xff]  ;;  %v348_v63 = vld [vmem:[#allocation5 + $0x308] sm:$0xff]  ;;  %v337_v4 = vld [vmem:[#allocation5 + $0x2b0] sm:$0xff] }
  0x47   : > { %473 = vmatpush.msra.mxu1 %v377_v41  ;;  %513 = vmatpush.msra.mxu3 %v378_v43  ;;  %v343_v0 = vld [vmem:[#allocation5 + $0x2e0] sm:$0xff]  ;;  %v344_v2 = vld [vmem:[#allocation5 + $0x2e8] sm:$0xff]  ;;  %v433_v5 = vld [vmem:[#allocation5 + $0x5b0] sm:$0xff] }
  0x48   : > { %454 = vmatpush.msra.mxu0 %v275_v44  ;;  %494 = vmatpush.msra.mxu2 %v276_v46  ;;  %v439_v1 = vld [vmem:[#allocation5 + $0x5e0] sm:$0xff]  ;;  %v440_v3 = vld [vmem:[#allocation5 + $0x5e8] sm:$0xff]  ;;  %v338_v6 = vld [vmem:[#allocation5 + $0x2b8] sm:$0xff] }
  0x49   : > { %474 = vmatpush.msra.mxu1 %v371_v45  ;;  %514 = vmatpush.msra.mxu3 %v372_v47  ;;  %v434_v7 = vld [vmem:[#allocation5 + $0x5b8] sm:$0xff]  ;;  %v331_v8 = vld [vmem:[#allocation5 + $0x280] sm:$0xff]  ;;  %v332_v10 = vld [vmem:[#allocation5 + $0x288] sm:$0xff] }
  0x4a   : > { %455 = vmatpush.msra.mxu0 %v269_v48  ;;  %495 = vmatpush.msra.mxu2 %v270_v50  ;;  %v427_v9 = vld [vmem:[#allocation5 + $0x580] sm:$0xff]  ;;  %v428_v11 = vld [vmem:[#allocation5 + $0x588] sm:$0xff]  ;;  %v325_v12 = vld [vmem:[#allocation5 + $0x250] sm:$0xff] }
  0x4b   : > { %475 = vmatpush.msra.mxu1 %v365_v49  ;;  %515 = vmatpush.msra.mxu3 %v366_v51  ;;  %v421_v13 = vld [vmem:[#allocation5 + $0x550] sm:$0xff]  ;;  %v326_v14 = vld [vmem:[#allocation5 + $0x258] sm:$0xff]  ;;  %v319_v16 = vld [vmem:[#allocation5 + $0x220] sm:$0xff] }
  0x4c   : > { %456 = vmatpush.msra.mxu0 %v263_v52  ;;  %496 = vmatpush.msra.mxu2 %v264_v54  ;;  %v422_v15 = vld [vmem:[#allocation5 + $0x558] sm:$0xff]  ;;  %v415_v17 = vld [vmem:[#allocation5 + $0x520] sm:$0xff]  ;;  %v320_v18 = vld [vmem:[#allocation5 + $0x228] sm:$0xff] }
  0x4d   : > { %476 = vmatpush.msra.mxu1 %v359_v53  ;;  %516 = vmatpush.msra.mxu3 %v360_v55  ;;  %v416_v19 = vld [vmem:[#allocation5 + $0x528] sm:$0xff]  ;;  %v313_v20 = vld [vmem:[#allocation5 + $0x1f0] sm:$0xff]  ;;  %v314_v22 = vld [vmem:[#allocation5 + $0x1f8] sm:$0xff] }
  0x4e   : > { %457 = vmatpush.msra.mxu0 %v257_v56  ;;  %497 = vmatpush.msra.mxu2 %v258_v58  ;;  %v409_v21 = vld [vmem:[#allocation5 + $0x4f0] sm:$0xff]  ;;  %v410_v23 = vld [vmem:[#allocation5 + $0x4f8] sm:$0xff]  ;;  %v307_v24 = vld [vmem:[#allocation5 + $0x1c0] sm:$0xff] }
  0x4f   : > { %477 = vmatpush.msra.mxu1 %v353_v57  ;;  %517 = vmatpush.msra.mxu3 %v354_v59  ;;  %v403_v25 = vld [vmem:[#allocation5 + $0x4c0] sm:$0xff]  ;;  %v308_v26 = vld [vmem:[#allocation5 + $0x1c8] sm:$0xff]  ;;  %v301_v28 = vld [vmem:[#allocation5 + $0x190] sm:$0xff] }
  0x50   : > { %458 = vmatpush.msra.mxu0 %v251_v60  ;;  %498 = vmatpush.msra.mxu2 %v252_v62  ;;  %v404_v27 = vld [vmem:[#allocation5 + $0x4c8] sm:$0xff]  ;;  %v397_v29 = vld [vmem:[#allocation5 + $0x490] sm:$0xff]  ;;  %v302_v30 = vld [vmem:[#allocation5 + $0x198] sm:$0xff] }
  0x51   : > { %478 = vmatpush.msra.mxu1 %v347_v61  ;;  %518 = vmatpush.msra.mxu3 %v348_v63  ;;  %v398_v31 = vld [vmem:[#allocation5 + $0x498] sm:$0xff]  ;;  %v295_v32 = vld [vmem:[#allocation5 + $0x160] sm:$0xff]  ;;  %v296_v34 = vld [vmem:[#allocation5 + $0x168] sm:$0xff] }
  0x52   : > { %523 = vmatpush.msrb.mxu0 %v343_v0  ;;  %563 = vmatpush.msrb.mxu2 %v344_v2  ;;  %v391_v33 = vld [vmem:[#allocation5 + $0x460] sm:$0xff]  ;;  %v392_v35 = vld [vmem:[#allocation5 + $0x468] sm:$0xff]  ;;  %v289_v36 = vld [vmem:[#allocation5 + $0x130] sm:$0xff] }
  0x53   : > { %543 = vmatpush.msrb.mxu1 %v439_v1  ;;  %583 = vmatpush.msrb.mxu3 %v440_v3  ;;  %v385_v37 = vld [vmem:[#allocation5 + $0x430] sm:$0xff]  ;;  %v290_v38 = vld [vmem:[#allocation5 + $0x138] sm:$0xff]  ;;  %v283_v40 = vld [vmem:[#allocation5 + $0x100] sm:$0xff] }
  0x54   : > { %524 = vmatpush.msrb.mxu0 %v337_v4  ;;  %564 = vmatpush.msrb.mxu2 %v338_v6  ;;  %v386_v39 = vld [vmem:[#allocation5 + $0x438] sm:$0xff]  ;;  %v379_v41 = vld [vmem:[#allocation5 + $0x400] sm:$0xff]  ;;  %v284_v42 = vld [vmem:[#allocation5 + $0x108] sm:$0xff] }
  0x55   : > { %544 = vmatpush.msrb.mxu1 %v433_v5  ;;  %584 = vmatpush.msrb.mxu3 %v434_v7  ;;  %v380_v43 = vld [vmem:[#allocation5 + $0x408] sm:$0xff]  ;;  %v277_v44 = vld [vmem:[#allocation5 + $0xd0] sm:$0xff]  ;;  %v278_v46 = vld [vmem:[#allocation5 + $0xd8] sm:$0xff] }
  0x56   : > { %525 = vmatpush.msrb.mxu0 %v331_v8  ;;  %565 = vmatpush.msrb.mxu2 %v332_v10  ;;  %v373_v45 = vld [vmem:[#allocation5 + $0x3d0] sm:$0xff]  ;;  %v374_v47 = vld [vmem:[#allocation5 + $0x3d8] sm:$0xff]  ;;  %v271_v50 = vld [vmem:[#allocation5 + $0xa0] sm:$0xff] }
  0x57   : > { %545 = vmatpush.msrb.mxu1 %v427_v9  ;;  %585 = vmatpush.msrb.mxu3 %v428_v11  ;;  %v1652_v48 = vld [vmem:[%s1641_s30] sm:$0xff]  ;;  %v1655_v49 = vld [vmem:[%s1641_s30 + $0x8] sm:$0xff] }
  0x58   : > { %526 = vmatpush.msrb.mxu0 %v325_v12  ;;  %566 = vmatpush.msrb.mxu2 %v326_v14  ;;  %v367_v51 = vld [vmem:[#allocation5 + $0x3a0] sm:$0xff]  ;;  %v272_v52 = vld [vmem:[#allocation5 + $0xa8] sm:$0xff]  ;;  %v265_v54 = vld [vmem:[#allocation5 + $0x70] sm:$0xff] }
  0x59   : > { %546 = vmatpush.msrb.mxu1 %v421_v13  ;;  %586 = vmatpush.msrb.mxu3 %v422_v15  ;;  %v368_v53 = vld [vmem:[#allocation5 + $0x3a8] sm:$0xff]  ;;  %v361_v55 = vld [vmem:[#allocation5 + $0x370] sm:$0xff]  ;;  %v266_v56 = vld [vmem:[#allocation5 + $0x78] sm:$0xff] }
  0x5a   : > { %527 = vmatpush.msrb.mxu0 %v319_v16  ;;  %567 = vmatpush.msrb.mxu2 %v320_v18  ;;  %v362_v57 = vld [vmem:[#allocation5 + $0x378] sm:$0xff]  ;;  %v259_v58 = vld [vmem:[#allocation5 + $0x40] sm:$0xff]  ;;  %v260_v60 = vld [vmem:[#allocation5 + $0x48] sm:$0xff] }
  0x5b   : > { %547 = vmatpush.msrb.mxu1 %v415_v17  ;;  %587 = vmatpush.msrb.mxu3 %v416_v19  ;;  %v355_v59 = vld [vmem:[#allocation5 + $0x340] sm:$0xff]  ;;  %v356_v61 = vld [vmem:[#allocation5 + $0x348] sm:$0xff]  ;;  %v253_v62 = vld [vmem:[#allocation5 + $0x10] sm:$0xff] }
  0x5c   : > { %528 = vmatpush.msrb.mxu0 %v313_v20  ;;  %568 = vmatpush.msrb.mxu2 %v314_v22  ;;  %v349_v63 = vld [vmem:[#allocation5 + $0x310] sm:$0xff]  ;;  %v254_v0 = vld [vmem:[#allocation5 + $0x18] sm:$0xff]  ;;  %v339_v3 = vld [vmem:[#allocation5 + $0x2c0] sm:$0xff] }
  0x5d   : > { %548 = vmatpush.msrb.mxu1 %v409_v21  ;;  %588 = vmatpush.msrb.mxu3 %v410_v23  ;;  %v350_v1 = vld [vmem:[#allocation5 + $0x318] sm:$0xff]  ;;  %v345_v2 = vld [vmem:[#allocation5 + $0x2f0] sm:$0xff]  ;;  %v327_v5 = vld [vmem:[#allocation5 + $0x260] sm:$0xff] }
  0x5e   : > { %529 = vmatpush.msrb.mxu0 %v307_v24  ;;  %569 = vmatpush.msrb.mxu2 %v308_v26  ;;  %v333_v4 = vld [vmem:[#allocation5 + $0x290] sm:$0xff]  ;;  %v315_v7 = vld [vmem:[#allocation5 + $0x200] sm:$0xff]  ;;  %v346_v18 = vld [vmem:[#allocation5 + $0x2f8] sm:$0xff] }
  0x5f   : > { %549 = vmatpush.msrb.mxu1 %v403_v25  ;;  %589 = vmatpush.msrb.mxu3 %v404_v27  ;;  %v321_v6 = vld [vmem:[#allocation5 + $0x230] sm:$0xff]  ;;  %v303_v9 = vld [vmem:[#allocation5 + $0x1a0] sm:$0xff]  ;;  %v442_v19 = vld [vmem:[#allocation5 + $0x5f8] sm:$0xff] }
  0x60   : > { %530 = vmatpush.msrb.mxu0 %v301_v28  ;;  %570 = vmatpush.msrb.mxu2 %v302_v30  ;;  %v309_v8 = vld [vmem:[#allocation5 + $0x1d0] sm:$0xff]  ;;  %v291_v11 = vld [vmem:[#allocation5 + $0x140] sm:$0xff]  ;;  %v340_v20 = vld [vmem:[#allocation5 + $0x2c8] sm:$0xff] }
  0x61   : > { %550 = vmatpush.msrb.mxu1 %v397_v29  ;;  %590 = vmatpush.msrb.mxu3 %v398_v31  ;;  %v297_v10 = vld [vmem:[#allocation5 + $0x170] sm:$0xff]  ;;  %v279_v13 = vld [vmem:[#allocation5 + $0xe0] sm:$0xff]  ;;  %v436_v21 = vld [vmem:[#allocation5 + $0x5c8] sm:$0xff] }
  0x62   : > { %531 = vmatpush.msrb.mxu0 %v295_v32  ;;  %571 = vmatpush.msrb.mxu2 %v296_v34  ;;  %v285_v12 = vld [vmem:[#allocation5 + $0x110] sm:$0xff]  ;;  %v267_v15 = vld [vmem:[#allocation5 + $0x80] sm:$0xff]  ;;  %v334_v22 = vld [vmem:[#allocation5 + $0x298] sm:$0xff] }
  0x63   : > { %551 = vmatpush.msrb.mxu1 %v391_v33  ;;  %591 = vmatpush.msrb.mxu3 %v392_v35  ;;  %v273_v14 = vld [vmem:[#allocation5 + $0xb0] sm:$0xff]  ;;  %v255_v17 = vld [vmem:[#allocation5 + $0x20] sm:$0xff]  ;;  %v430_v23 = vld [vmem:[#allocation5 + $0x598] sm:$0xff] }
  0x64   : > { %532 = vmatpush.msrb.mxu0 %v289_v36  ;;  %572 = vmatpush.msrb.mxu2 %v290_v38  ;;  %v261_v16 = vld [vmem:[#allocation5 + $0x50] sm:$0xff]  ;;  %v435_v25 = vld [vmem:[#allocation5 + $0x5c0] sm:$0xff]  ;;  %v328_v28 = vld [vmem:[#allocation5 + $0x268] sm:$0xff] }
  0x65   : > { %552 = vmatpush.msrb.mxu1 %v385_v37  ;;  %592 = vmatpush.msrb.mxu3 %v386_v39  ;;  %v441_v24 = vld [vmem:[#allocation5 + $0x5f0] sm:$0xff]  ;;  %v424_v29 = vld [vmem:[#allocation5 + $0x568] sm:$0xff]  ;;  %v322_v31 = vld [vmem:[#allocation5 + $0x238] sm:$0xff] }
  0x66   : > { %533 = vmatpush.msrb.mxu0 %v283_v40  ;;  %573 = vmatpush.msrb.mxu2 %v284_v42  ;;  %v429_v30 = vld [vmem:[#allocation5 + $0x590] sm:$0xff]  ;;  %v418_v32 = vld [vmem:[#allocation5 + $0x538] sm:$0xff]  ;;  %v423_v33 = vld [vmem:[#allocation5 + $0x560] sm:$0xff] }
  0x67   : > { %553 = vmatpush.msrb.mxu1 %v379_v41  ;;  %593 = vmatpush.msrb.mxu3 %v380_v43  ;;  %v316_v34 = vld [vmem:[#allocation5 + $0x208] sm:$0xff]  ;;  %v417_v36 = vld [vmem:[#allocation5 + $0x530] sm:$0xff]  ;;  %v310_v37 = vld [vmem:[#allocation5 + $0x1d8] sm:$0xff] }
  0x68   : > { %534 = vmatpush.msrb.mxu0 %v277_v44  ;;  %574 = vmatpush.msrb.mxu2 %v278_v46  ;;  %v412_v35 = vld [vmem:[#allocation5 + $0x508] sm:$0xff]  ;;  %v406_v38 = vld [vmem:[#allocation5 + $0x4d8] sm:$0xff]  ;;  %v411_v41 = vld [vmem:[#allocation5 + $0x500] sm:$0xff] }
  0x69   : > { %554 = vmatpush.msrb.mxu1 %v373_v45  ;;  %594 = vmatpush.msrb.mxu3 %v374_v47  ;;  %v304_v42 = vld [vmem:[#allocation5 + $0x1a8] sm:$0xff]  ;;  %v405_v44 = vld [vmem:[#allocation5 + $0x4d0] sm:$0xff] }
  0x6a   : > { %459 = vmatmul.f32.vlgmr.msra.gmra.mxu0 %v1652_v48  ;;  %479 = vmatmul.f32.vlgmr.msra.gmra.mxu1 %v1655_v49  ;;  %v400_v43 = vld [vmem:[#allocation5 + $0x4a8] sm:$0xff] }
  0x6b   : > { %499 = vmatmul.f32.vlgmr.msra.gmra.mxu2 %v1652_v48  ;;  %519 = vmatmul.f32.vlgmr.msra.gmra.mxu3 %v1655_v49 }
  0x6c   : > { %535 = vmatpush.msrb.mxu0 %v271_v50  ;;  %555 = vmatpush.msrb.mxu1 %v367_v51  ;;  %v298_v51 = vld [vmem:[#allocation5 + $0x178] sm:$0xff] }
  0x6d   : > { %575 = vmatpush.msrb.mxu2 %v272_v52  ;;  %595 = vmatpush.msrb.mxu3 %v368_v53  ;;  %v394_v52 = vld [vmem:[#allocation5 + $0x478] sm:$0xff]  ;;  %v399_v53 = vld [vmem:[#allocation5 + $0x4a0] sm:$0xff] }
  0x6e   : > { %536 = vmatpush.msrb.mxu0 %v265_v54  ;;  %556 = vmatpush.msrb.mxu1 %v361_v55  ;;  %v292_v54 = vld [vmem:[#allocation5 + $0x148] sm:$0xff] }
  0x6f   : > { %576 = vmatpush.msrb.mxu2 %v266_v56  ;;  %596 = vmatpush.msrb.mxu3 %v362_v57  ;;  %v388_v56 = vld [vmem:[#allocation5 + $0x448] sm:$0xff]  ;;  %v393_v57 = vld [vmem:[#allocation5 + $0x470] sm:$0xff] }
  0x70   : > { %537 = vmatpush.msrb.mxu0 %v259_v58  ;;  %557 = vmatpush.msrb.mxu1 %v355_v59  ;;  %v286_v58 = vld [vmem:[#allocation5 + $0x118] sm:$0xff] }
  0x71   : > { %577 = vmatpush.msrb.mxu2 %v260_v60  ;;  %597 = vmatpush.msrb.mxu3 %v356_v61  ;;  %v382_v59 = vld [vmem:[#allocation5 + $0x418] sm:$0xff]  ;;  %v387_v60 = vld [vmem:[#allocation5 + $0x440] sm:$0xff] }
  0x72   : > { %538 = vmatpush.msrb.mxu0 %v253_v62  ;;  %558 = vmatpush.msrb.mxu1 %v349_v63 }
  0x73   : > { %578 = vmatpush.msrb.mxu2 %v254_v0  ;;  %598 = vmatpush.msrb.mxu3 %v350_v1  ;;  %v280_v1 = vld [vmem:[#allocation5 + $0xe8] sm:$0xff] }
  0x74   : > { %539 = vmatmul.f32.vlgmr.msrb.gmra.mxu0 %v1652_v48  ;;  %559 = vmatmul.f32.vlgmr.msrb.gmra.mxu1 %v1655_v49 }
  0x75   : > { %579 = vmatmul.f32.vlgmr.msrb.gmra.mxu2 %v1652_v48  ;;  %599 = vmatmul.f32.vlgmr.msrb.gmra.mxu3 %v1655_v49 }
  0x76   : > { %603 = vmatpush.msra.mxu0 %v345_v2  ;;  %643 = vmatpush.msra.mxu2 %v346_v18  ;;  %v376_v2 = vld [vmem:[#allocation5 + $0x3e8] sm:$0xff] }
  0x77   : > { %663 = vmatpush.msra.mxu3 %v442_v19  ;;  %623 = vmatpush.msra.mxu1 %v441_v24 }
  0x78   : > { %604 = vmatpush.msra.mxu0 %v339_v3  ;;  %644 = vmatpush.msra.mxu2 %v340_v20  ;;  %v381_v3 = vld [vmem:[#allocation5 + $0x410] sm:$0xff]  ;;  %v683_v20 = vlaneseq }
  0x79   : > { %664 = vmatpush.msra.mxu3 %v436_v21  ;;  %624 = vmatpush.msra.mxu1 %v435_v25 }
  0x7a   : > { %605 = vmatpush.msra.mxu0 %v333_v4  ;;  %645 = vmatpush.msra.mxu2 %v334_v22  ;;  %v274_v4 = vld [vmem:[#allocation5 + $0xb8] sm:$0xff] }
  0x7b   : > { %665 = vmatpush.msra.mxu3 %v430_v23  ;;  %625 = vmatpush.msra.mxu1 %v429_v30  ;;  %v686_v23 = vand.u32 127, %v683_v20 }
  0x7c   : > { %606 = vmatpush.msra.mxu0 %v327_v5  ;;  %646 = vmatpush.msra.mxu2 %v328_v28  ;;  %v370_v5 = vld [vmem:[#allocation5 + $0x3b8] sm:$0xff] }
  0x7d   : > { %666 = vmatpush.msra.mxu3 %v424_v29  ;;  %626 = vmatpush.msra.mxu1 %v423_v33 }
  0x7e   : > { %607 = vmatpush.msra.mxu0 %v321_v6  ;;  %647 = vmatpush.msra.mxu2 %v322_v31 }
  0x7f   : > { %667 = vmatpush.msra.mxu3 %v418_v32  ;;  %627 = vmatpush.msra.mxu1 %v417_v36 }
  0x80   : > { %608 = vmatpush.msra.mxu0 %v315_v7  ;;  %648 = vmatpush.msra.mxu2 %v316_v34  ;;  %v268_v7 = vld [vmem:[#allocation5 + $0x88] sm:$0xff] }
  0x81   : > { %668 = vmatpush.msra.mxu3 %v412_v35  ;;  %628 = vmatpush.msra.mxu1 %v411_v41 }
  0x82   : > { %609 = vmatpush.msra.mxu0 %v309_v8  ;;  %649 = vmatpush.msra.mxu2 %v310_v37  ;;  %v375_v8 = vld [vmem:[#allocation5 + $0x3e0] sm:$0xff] }
  0x83   : > { %669 = vmatpush.msra.mxu3 %v406_v38  ;;  %629 = vmatpush.msra.mxu1 %v405_v44 }
  0x84   : > { %610 = vmatpush.msra.mxu0 %v303_v9  ;;  %650 = vmatpush.msra.mxu2 %v304_v42  ;;  %v364_v9 = vld [vmem:[#allocation5 + $0x388] sm:$0xff] }
  0x85   : > { %670 = vmatpush.msra.mxu3 %v400_v43  ;;  %630 = vmatpush.msra.mxu1 %v399_v53 }
  0x86   : > { %611 = vmatpush.msra.mxu0 %v297_v10  ;;  %651 = vmatpush.msra.mxu2 %v298_v51  ;;  %v262_v10 = vld [vmem:[#allocation5 + $0x58] sm:$0xff] }
  0x87   : > { %671 = vmatpush.msra.mxu3 %v394_v52  ;;  %631 = vmatpush.msra.mxu1 %v393_v57 }
  0x88   : > { %612 = vmatpush.msra.mxu0 %v291_v11  ;;  %652 = vmatpush.msra.mxu2 %v292_v54  ;;  %v369_v11 = vld [vmem:[#allocation5 + $0x3b0] sm:$0xff] }
  0x89   : > { %672 = vmatpush.msra.mxu3 %v388_v56  ;;  %632 = vmatpush.msra.mxu1 %v387_v60 }
  0x8a   : > { %613 = vmatpush.msra.mxu0 %v285_v12  ;;  %653 = vmatpush.msra.mxu2 %v286_v58  ;;  %v358_v12 = vld [vmem:[#allocation5 + $0x358] sm:$0xff] }
  0x8b   : > { %673 = vmatpush.msra.mxu3 %v382_v59  ;;  %633 = vmatpush.msra.mxu1 %v381_v3 }
  0x8c   : > { %614 = vmatpush.msra.mxu0 %v279_v13  ;;  %654 = vmatpush.msra.mxu2 %v280_v1  ;;  %v256_v13 = vld [vmem:[#allocation5 + $0x28] sm:$0xff] }
  0x8d   : > { %674 = vmatpush.msra.mxu3 %v376_v2  ;;  %634 = vmatpush.msra.mxu1 %v375_v8 }
  0x8e   : > { %615 = vmatpush.msra.mxu0 %v273_v14  ;;  %655 = vmatpush.msra.mxu2 %v274_v4  ;;  %v352_v14 = vld [vmem:[#allocation5 + $0x328] sm:$0xff] }
  0x8f   : > { %675 = vmatpush.msra.mxu3 %v370_v5  ;;  %635 = vmatpush.msra.mxu1 %v369_v11 }
  0x90   : > { %616 = vmatpush.msra.mxu0 %v267_v15  ;;  %656 = vmatpush.msra.mxu2 %v268_v7  ;;  %v363_v15 = vld [vmem:[#allocation5 + $0x380] sm:$0xff] }
  0x91   : > { %676 = vmatpush.msra.mxu3 %v364_v9  ;;  %636 = vmatpush.msra.mxu1 %v363_v15  ;;  %v989_v15 = vld [vmem:[#allocation7 + $0xf8] sm:$0xff] }
  0x92   : > { %617 = vmatpush.msra.mxu0 %v261_v16  ;;  %657 = vmatpush.msra.mxu2 %v262_v10  ;;  %v357_v16 = vld [vmem:[#allocation5 + $0x350] sm:$0xff] }
  0x93   : > { %677 = vmatpush.msra.mxu3 %v358_v12  ;;  %637 = vmatpush.msra.mxu1 %v357_v16  ;;  %v1021_v16 = vld [vmem:[#allocation7 + $0x1f8] sm:$0xff] }
  0x94   : > { %618 = vmatpush.msra.mxu0 %v255_v17  ;;  %658 = vmatpush.msra.mxu2 %v256_v13  ;;  %v351_v17 = vld [vmem:[#allocation5 + $0x320] sm:$0xff]  ;;  %v988_v13 = vld [vmem:[#allocation7 + $0xf0] sm:$0xff] }
  0x95   : > { %619 = vmatmul.f32.vlgmr.msra.gmra.mxu0 %v1652_v48  ;;  %678 = vmatpush.msra.mxu3 %v352_v14  ;;  %v1020_v14 = vld [vmem:[#allocation7 + $0x1f0] sm:$0xff] }
  0x96   : > { %659 = vmatmul.f32.vlgmr.msra.gmra.mxu2 %v1652_v48  ;;  %679 = vmatmul.f32.vlgmr.msra.gmra.mxu3 %v1655_v49  ;;  %v684_v48 = vshrl.u32 %v683_v20, 7  ;;  %v1019_v20 = vld [vmem:[#allocation7 + $0x1e8] sm:$0xff] }
  0x97   : > { %638 = vmatpush.msra.mxu1 %v351_v17  ;;  %v986_v17 = vld [vmem:[#allocation7 + $0xe0] sm:$0xff] }
  0x98   : > { %639 = vmatmul.f32.vlgmr.msra.gmra.mxu1 %v1655_v49  ;;  %vm687_vm1 = vcmp.le.s32.totalorder %v686_v23, %v684_v48  ;;  %v985_v48 = vld [vmem:[#allocation7 + $0xd8] sm:$0xff] }
  0x99   : > { %v1017_v23 = vld [vmem:[#allocation7 + $0x1d8] sm:$0xff] }
  0xe7   : > { %v460_v26 = vpop.f32.mrf.mxu0  ;;  %v480_v27 = vpop.f32.mrf.mxu1 }
  0xe8   : > { %v481_v45 = vadd.f32 %v480_v27, %v460_v26 }
  0xea   : > { %v688_v55 = vmul.f32 0.125, %v481_v45 }
  0xee   : > { %v500_v39 = vpop.f32.mrf.mxu2  ;;  %v520_v40 = vpop.f32.mrf.mxu3 }
  0xef   : > { %v521_v63 = vadd.f32 %v520_v40, %v500_v39 }
  0xf1   : > { %v540_v46 = vpop.f32.mrf.mxu0  ;;  %v560_v47 = vpop.f32.mrf.mxu1  ;;  %v819_v6 = vmul.f32 0.125, %v521_v63 }
  0xf2   : > { %v561_v50 = vadd.f32 %v560_v47, %v540_v46 }
  0xf4   : > { %754 = vrot.lane.b32.xlu0 %v561_v50, %s1509_s23  ;;  %1229 = vmatpush.xpose.msk.msrb.mxu0 %vm689_vm0, %v561_v50 }
  0xf7   : > { %1230 = vmatmul.msk.f32.vlgmr.msrb.gmra.mxu0 %vm689_vm0, %v688_v55 }
  0xf8   : > { %v580_v61 = vpop.f32.mrf.mxu2  ;;  %v600_v62 = vpop.f32.mrf.mxu3 }
  0xf9   : > { %v601_v0 = vadd.f32 %v600_v62, %v580_v61 }
  0xfb   : > { %883 = vrot.lane.b32.xlu1 %v601_v0, %s1509_s23  ;;  %1235 = vmatpush.xpose.msk.msra.mxu0 %vm689_vm0, %v601_v0 }
  0xfc   : > { %752 = vrot.lane.b32.xlu0 %v688_v55, %s1509_s23 }
  0xff   : > { %1236 = vmatmul.msk.f32.vlgmr.msra.gmra.mxu0 %vm689_vm0, %v819_v6 }
 0x100   : > { %1028 = vmatpush.msrb.mxu0 %v988_v13  ;;  %v990_v13 = vld [vmem:[#allocation7 + $0x100] sm:$0xff] }
 0x102   : > { %1029 = vmatpush.msrb.mxu0 %v986_v17 }
 0x103   : > { %881 = vrot.lane.b32.xlu1 %v819_v6, %s1509_s23 }
 0x112   : > { %v620_v19 = vpop.f32.mrf.mxu0 }
 0x115   : > { %v640_v29 = vpop.f32.mrf.mxu1 }
 0x116   : > { %v641_v31 = vadd.f32 %v640_v29, %v620_v19  ;;  %v987_v19 = vld [vmem:[#allocation7 + $0xe8] sm:$0xff]  ;;  %v981_v29 = vld [vmem:[#allocation7 + $0xb8] sm:$0xff] }
 0x118   : > { %747 = vmatpush.msrb.mxu1 %v641_v31 }
 0x119   : > { %v660_v27 = vpop.f32.mrf.mxu2  ;;  %v680_v28 = vpop.f32.mrf.mxu3 }
 0x11a   : > { %v681_v30 = vadd.f32 %v680_v28, %v660_v27  ;;  %v980_v27 = vld [vmem:[#allocation7 + $0xb0] sm:$0xff] }
 0x11b   : > { %v1012_v28 = vld [vmem:[#allocation7 + $0x1b0] sm:$0xff] }
 0x11c   : > { %876 = vmatpush.msra.mxu1 %v681_v30 }
 0x166   : > { %v755_v18 = vpop.permute.xlu0 %754 }
 0x167   : > { %1232 = vmatpush.xpose.msk.msrb.mxu2 %vm689_vm0, %v755_v18  ;;  %v1018_v18 = vld [vmem:[#allocation7 + $0x1e0] sm:$0xff] }
 0x16d   : > { %v884_v21 = vpop.permute.xlu1 %883 }
 0x16e   : > { %v753_v22 = vpop.permute.xlu0 %752  ;;  %1238 = vmatpush.xpose.msk.msra.mxu2 %vm689_vm0, %v884_v21  ;;  %v984_v21 = vld [vmem:[#allocation7 + $0xd0] sm:$0xff] }
 0x16f   : > { %1233 = vmatmul.msk.f32.vlgmr.msrb.gmra.mxu2 %vm689_vm0, %v753_v22  ;;  %v1016_v22 = vld [vmem:[#allocation7 + $0x1d0] sm:$0xff]  ;;  %1030 = vmatpush.msrb.mxu0 %v984_v21 }
 0x172   : > { %1068 = vmatpush.msrb.mxu2 %v989_v15  ;;  %v991_v15 = vld [vmem:[#allocation7 + $0x108] sm:$0xff] }
 0x174   : > { %v713_v24 = vpop.f32.mrf.mxu0  ;;  %1069 = vmatpush.msrb.mxu2 %v987_v19 }
 0x175   : > { %v716_v25 = vsel %vm687_vm1, %v713_v24, -inf  ;;  %v882_v26 = vpop.permute.xlu1 %881  ;;  %v982_v24 = vld [vmem:[#allocation7 + $0xc0] sm:$0xff] }
 0x176   : > { %v718_v49 = vsel %vm717_vm2, %v716_v25, -inf  ;;  %1070 = vmatpush.msrb.mxu2 %v985_v48  ;;  %1031 = vmatpush.msrb.mxu0 %v982_v24  ;;  %v1022_v48 = vld [vmem:[%s1743_s3] sm:$0x3] }
 0x177   : > { %1239 = vmatmul.msk.f32.vlgmr.msra.gmra.mxu2 %vm689_vm0, %v882_v26  ;;  %719 = vmax.xlane.f32.xlu0 %v718_v49  ;;  %v983_v26 = vld [vmem:[#allocation7 + $0xc8] sm:$0xff] }
 0x178   : > { %v1015_v49 = vld [vmem:[#allocation7 + $0x1c8] sm:$0xff]  ;;  %1071 = vmatpush.msrb.mxu2 %v983_v26  ;;  %1032 = vmatpush.msrb.mxu0 %v980_v27  ;;  %v1025_v27 = vperm.slane %v1022_v48, 1 }
 0x17a   : > { %1072 = vmatpush.msrb.mxu2 %v981_v29 }
 0x17c   : > { %v843_v43 = vpop.f32.mrf.mxu0 }
 0x17d   : > { %v846_v44 = vsel %vm687_vm1, %v843_v43, -inf  ;;  %v972_v43 = vld [vmem:[#allocation7 + $0x70] sm:$0xff] }
 0x17e   : > { %v847_v45 = vsel %vm717_vm2, %v846_v44, -inf }
 0x1ea   : > { %v720_v32 = vpop.xlane.xlu0 %719 }
 0x1eb   : > { %v721_v33 = vsub.f32 %v716_v25, %v720_v32  ;;  %v1014_v25 = vld [vmem:[#allocation7 + $0x1c0] sm:$0xff] }
 0x1ec   : > { %v1010_v32 = vld [vmem:[#allocation7 + $0x1a0] sm:$0xff] }
 0x1ed   : > { %v722_v34 = vmul.f32 1.442695, %v721_v33  ;;  %v979_v33 = vld [vmem:[#allocation7 + $0xa8] sm:$0xff] }
 0x1ee   : > { %1073 = vmatpush.msrb.mxu2 %v979_v33 }
 0x1ef   : > { %1325 = vpow2.f32 %v722_v34  ;;  %v1011_v34 = vld [vmem:[#allocation7 + $0x1a8] sm:$0xff] }
 0x1f2   : > { %v777_v35 = vpop.f32.mrf.mxu2 }
 0x1f3   : > { %v780_v36 = vsel %vm687_vm1, %v777_v35, -inf  ;;  %v976_v35 = vld [vmem:[#allocation7 + $0x90] sm:$0xff] }
 0x1f4   : > { %v781_v37 = vsel %vm717_vm2, %v780_v36, -inf }
 0x1f5   : > { %v1326_v38 = vpop.eup %1325  ;;  %782 = vmax.xlane.f32.xlu2 %v781_v37  ;;  %v977_v37 = vld [vmem:[#allocation7 + $0x98] sm:$0xff] }
 0x1f6   : > { %v724_v39 = vsel %vm717_vm2, %v1326_v38, 0.0  ;;  %1074 = vmatpush.msrb.mxu2 %v977_v37 }
 0x1f7   : > { %725 = vadd.xlane.f32.xlu0 %v724_v39  ;;  %v974_v39 = vld [vmem:[#allocation7 + $0x80] sm:$0xff] }
 0x1fa   : > { %v906_v40 = vpop.f32.mrf.mxu2 }
 0x1fb   : > { %v909_v41 = vsel %vm687_vm1, %v906_v40, -inf  ;;  %v1006_v40 = vld [vmem:[#allocation7 + $0x180] sm:$0xff] }
 0x1fc   : > { %v910_v42 = vsel %vm717_vm2, %v909_v41, -inf }
 0x1fd   : > { %911 = vmax.xlane.f32.xlu2 %v910_v42  ;;  %v1007_v42 = vld [vmem:[#allocation7 + $0x188] sm:$0xff] }
 0x205   : > { %848 = vmax.xlane.f32.xlu2 %v847_v45  ;;  %v973_v45 = vld [vmem:[#allocation7 + $0x78] sm:$0xff] }
 0x21d   : > { %793 = vrot.lane.b32.xlu2 %v641_v31, %s1509_s23  ;;  %v978_v31 = vld [vmem:[#allocation7 + $0xa0] sm:$0xff] }
 0x21e   : > { %1033 = vmatpush.msrb.mxu0 %v978_v31 }
 0x220   : > { %1034 = vmatpush.msrb.mxu0 %v976_v35 }
 0x222   : > { %1035 = vmatpush.msrb.mxu0 %v974_v39 }
 0x224   : > { %1036 = vmatpush.msrb.mxu0 %v972_v43 }
 0x268   : > { %v783_v46 = vpop.xlane.xlu2 %782 }
 0x269   : > { %v784_v47 = vsub.f32 %v780_v36, %v783_v46  ;;  %v1008_v36 = vld [vmem:[#allocation7 + $0x190] sm:$0xff]  ;;  %v1005_v46 = vld [vmem:[#allocation7 + $0x178] sm:$0xff] }
 0x26a   : > { %v726_v50 = vpop.xlane.xlu0 %725 }
 0x26b   : > { %v785_v51 = vmul.f32 1.442695, %v784_v47  ;;  %1327 = vrcp.f32 %v726_v50  ;;  %v970_v47 = vld [vmem:[#allocation7 + $0x60] sm:$0xff] }
 0x26c   : > { %v1002_v50 = vld [vmem:[#allocation7 + $0x160] sm:$0xff]  ;;  %1037 = vmatpush.msrb.mxu0 %v970_v47 }
 0x26d   : > { %1329 = vpow2.f32 %v785_v51  ;;  %v971_v51 = vld [vmem:[#allocation7 + $0x68] sm:$0xff] }
 0x270   : > { %v912_v52 = vpop.xlane.xlu2 %911 }
 0x271   : > { %v1328_v53 = vpop.eup %1327  ;;  %v913_v54 = vsub.f32 %v909_v41, %v912_v52  ;;  %v975_v41 = vld [vmem:[#allocation7 + $0x88] sm:$0xff] }
 0x272   : > { %v728_v55 = vmul.f32 %v1328_v53, %v1326_v38  ;;  %v1009_v38 = vld [vmem:[#allocation7 + $0x198] sm:$0xff]  ;;  %1075 = vmatpush.msrb.mxu2 %v975_v41  ;;  %v1003_v52 = vld [vmem:[#allocation7 + $0x168] sm:$0xff]  ;;  %v968_v53 = vld [vmem:[#allocation7 + $0x50] sm:$0xff] }
 0x273   : > { %v1330_v56 = vpop.eup %1329  ;;  %v914_v57 = vmul.f32 1.442695, %v913_v54  ;;  %v1000_v54 = vld [vmem:[#allocation7 + $0x150] sm:$0xff]  ;;  %1038 = vmatpush.msrb.mxu0 %v968_v53 }
 0x274   : > { %1231 = vmatmul.msk.f32.vlgmr.msrb.gmra.mxu1 %vm717_vm2, %v728_v55  ;;  %v787_v58 = vsel %vm717_vm2, %v1330_v56, 0.0  ;;  %1076 = vmatpush.msrb.mxu2 %v973_v45  ;;  %v969_v55 = vld [vmem:[#allocation7 + $0x58] sm:$0xff] }
 0x275   : > { %1331 = vpow2.f32 %v914_v57  ;;  %788 = vadd.xlane.f32.xlu1 %v787_v58  ;;  %1048 = vmatpush.msrb.mxu1 %v1020_v14  ;;  %v966_v57 = vld [vmem:[#allocation7 + $0x40] sm:$0xff]  ;;  %v959_v14 = vld [vmem:[#allocation7 + $0x8] sm:$0xff] }
 0x276   : > { %1077 = vmatpush.msrb.mxu2 %v971_v51  ;;  %v998_v58 = vld [vmem:[#allocation7 + $0x140] sm:$0xff]  ;;  %1039 = vmatpush.msrb.mxu0 %v966_v57 }
 0x277   : > { %1049 = vmatpush.msrb.mxu1 %v1018_v18 }
 0x278   : > { %v849_v59 = vpop.xlane.xlu2 %848  ;;  %1078 = vmatpush.msrb.mxu2 %v969_v55 }
 0x279   : > { %v850_v60 = vsub.f32 %v846_v44, %v849_v59  ;;  %1050 = vmatpush.msrb.mxu1 %v1016_v22  ;;  %v1004_v44 = vld [vmem:[#allocation7 + $0x170] sm:$0xff] }
 0x27b   : > { %v1332_v61 = vpop.eup %1331  ;;  %v851_v62 = vmul.f32 1.442695, %v850_v60  ;;  %1051 = vmatpush.msrb.mxu1 %v1014_v25  ;;  %v967_v60 = vld [vmem:[#allocation7 + $0x48] sm:$0xff] }
 0x27c   : > { %v916_v63 = vsel %vm717_vm2, %v1332_v61, 0.0  ;;  %1079 = vmatpush.msrb.mxu2 %v967_v60 }
 0x27d   : > { %1333 = vpow2.f32 %v851_v62  ;;  %917 = vadd.xlane.f32.xlu2 %v916_v63  ;;  %1052 = vmatpush.msrb.mxu1 %v1012_v28  ;;  %v964_v62 = vld [vmem:[#allocation7 + $0x30] sm:$0xff] }
 0x27e   : > { %v996_v63 = vld [vmem:[#allocation7 + $0x130] sm:$0xff]  ;;  %1040 = vmatpush.msrb.mxu0 %v964_v62 }
 0x27f   : > { %1053 = vmatpush.msrb.mxu1 %v1010_v32 }
 0x280   : > { %v794_v0 = vpop.permute.xlu2 %793 }
 0x281   : > { %814 = vmatpush.msrb.mxu3 %v794_v0  ;;  %1054 = vmatpush.msrb.mxu1 %v1008_v36  ;;  %v965_v0 = vld [vmem:[#allocation7 + $0x38] sm:$0xff] }
 0x282   : > { %1080 = vmatpush.msrb.mxu2 %v965_v0 }
 0x283   : > { %v1334_v1 = vpop.eup %1333  ;;  %1055 = vmatpush.msrb.mxu1 %v1006_v40 }
 0x284   : > { %v853_v2 = vsel %vm717_vm2, %v1334_v1, 0.0 }
 0x285   : > { %854 = vadd.xlane.f32.xlu1 %v853_v2  ;;  %1056 = vmatpush.msrb.mxu1 %v1004_v44  ;;  %v962_v2 = vld [vmem:[#allocation7 + $0x20] sm:$0xff] }
 0x286   : > { %1041 = vmatpush.msrb.mxu0 %v962_v2 }
 0x287   : > { %1057 = vmatpush.msrb.mxu1 %v1002_v50 }
 0x289   : > { %1058 = vmatpush.msrb.mxu1 %v1000_v54 }
 0x28b   : > { %1059 = vmatpush.msrb.mxu1 %v998_v58 }
 0x28d   : > { %1060 = vmatpush.msrb.mxu1 %v996_v63 }
 0x295   : > { %922 = vrot.lane.b32.xlu2 %v681_v30, %s1509_s23  ;;  %v1013_v30 = vld [vmem:[#allocation7 + $0x1b8] sm:$0xff] }
 0x2e8   : > { %v789_v3 = vpop.xlane.xlu1 %788 }
 0x2e9   : > { %1335 = vrcp.f32 %v789_v3  ;;  %v994_v3 = vld [vmem:[#allocation7 + $0x120] sm:$0xff] }
 0x2ea   : > { %1061 = vmatpush.msrb.mxu1 %v994_v3 }
 0x2ef   : > { %v1336_v4 = vpop.eup %1335 }
 0x2f0   : > { %v791_v5 = vmul.f32 %v1336_v4, %v1330_v56  ;;  %v918_v6 = vpop.xlane.xlu2 %917  ;;  %v1001_v56 = vld [vmem:[#allocation7 + $0x158] sm:$0xff]  ;;  %v963_v4 = vld [vmem:[#allocation7 + $0x28] sm:$0xff] }
 0x2f1   : > { %1337 = vrcp.f32 %v918_v6  ;;  %1081 = vmatpush.msrb.mxu2 %v963_v4 }
 0x2f2   : > { %1234 = vmatmul.msk.f32.vlgmr.msrb.gmra.mxu3 %vm717_vm2, %v791_v5  ;;  %v995_v5 = vld [vmem:[#allocation7 + $0x128] sm:$0xff] }
 0x2f7   : > { %v1338_v7 = vpop.eup %1337 }
 0x2f8   : > { %v920_v8 = vmul.f32 %v1338_v7, %v1332_v61  ;;  %v855_v9 = vpop.xlane.xlu1 %854  ;;  %v923_v10 = vpop.permute.xlu2 %922  ;;  %v999_v61 = vld [vmem:[#allocation7 + $0x148] sm:$0xff] }
 0x2f9   : > { %1339 = vrcp.f32 %v855_v9  ;;  %943 = vmatpush.msra.mxu3 %v923_v10  ;;  %v992_v9 = vld [vmem:[#allocation7 + $0x110] sm:$0xff]  ;;  %v961_v10 = vld [vmem:[#allocation7 + $0x18] sm:$0xff] }
 0x2fa   : > { %1240 = vmatmul.msk.f32.vlgmr.msra.gmra.mxu3 %vm717_vm2, %v920_v8  ;;  %v960_v8 = vld [vmem:[#allocation7 + $0x10] sm:$0xff]  ;;  %1062 = vmatpush.msrb.mxu1 %v992_v9 }
 0x2fb   : > { %1088 = vmatpush.msrb.mxu3 %v1021_v16  ;;  %1042 = vmatpush.msrb.mxu0 %v960_v8  ;;  %v749_v16 = vpop.f32.mrf.mxu1 }
 0x2fc   : > { %1082 = vmatpush.msrb.mxu2 %v961_v10  ;;  %1063 = vmatpush.msrb.mxu1 %v990_v13 }
 0x2fd   : > { %1089 = vmatpush.msrb.mxu3 %v1019_v20 }
 0x2fe   : > { %1083 = vmatpush.msrb.mxu2 %v959_v14 }
 0x2ff   : > { %v1340_v11 = vpop.eup %1339  ;;  %1090 = vmatpush.msrb.mxu3 %v1017_v23  ;;  %v1024_v23 = vperm.slane %v1022_v48, 0 }
 0x300   : > { %v857_v12 = vmul.f32 %v1340_v11, %v1334_v1  ;;  %v997_v1 = vld [vmem:[#allocation7 + $0x138] sm:$0xff] }
 0x301   : > { %1091 = vmatpush.msrb.mxu3 %v1015_v49  ;;  %v993_v11 = vld [vmem:[#allocation7 + $0x118] sm:$0xff] }
 0x302   : > { %1237 = vmatmul.msk.f32.vlgmr.msra.gmra.mxu1 %vm717_vm2, %v857_v12  ;;  %v958_v12 = vld [vmem:[#allocation7] sm:$0xff] }
 0x303   : > { %1092 = vmatpush.msrb.mxu3 %v1013_v30  ;;  %1043 = vmatpush.msrb.mxu0 %v958_v12 }
 0x305   : > { %1093 = vmatpush.msrb.mxu3 %v1011_v34 }
 0x307   : > { %1094 = vmatpush.msrb.mxu3 %v1009_v38 }
 0x309   : > { %1095 = vmatpush.msrb.mxu3 %v1007_v42 }
 0x30b   : > { %1096 = vmatpush.msrb.mxu3 %v1005_v46 }
 0x30d   : > { %1097 = vmatpush.msrb.mxu3 %v1003_v52 }
 0x30f   : > { %1098 = vmatpush.msrb.mxu3 %v1001_v56 }
 0x311   : > { %1099 = vmatpush.msrb.mxu3 %v999_v61 }
 0x313   : > { %1100 = vmatpush.msrb.mxu3 %v997_v1 }
 0x315   : > { %1101 = vmatpush.msrb.mxu3 %v995_v5 }
 0x317   : > { %1102 = vmatpush.msrb.mxu3 %v993_v11 }
 0x319   : > { %1103 = vmatpush.msrb.mxu3 %v991_v15 }
 0x375   : > { %v816_v59 = vpop.f32.mrf.mxu3 }
 0x37d   : > { %v945_v6 = vpop.f32.mrf.mxu3 }
 0x37e   : > { %v1320_v7 = vpack.i.bf16 %v945_v6, %v816_v59 }
 0x37f   : > { %v878_v20 = vpop.f32.mrf.mxu1 }
 0x380   : > { %1321 = vrot.lane.b32.xlu2 %v1320_v7, %s1509_s23 }
 0x3da   : > { %v1322_v17 = vpop.permute.xlu2 %1321 }
 0x3db   : > { %v1324_v18 = vunpack.i.h.bf16 %v1322_v17  ;;  %v1323_v19 = vunpack.i.l.bf16 %v1322_v17 }
 0x3dd   : > { %v956_v21 = vsel %vm689_vm0, %v749_v16, %v1323_v19  ;;  %v957_v22 = vsel %vm689_vm0, %v878_v20, %v1324_v18 }
 0x3de   : > { %1044 = vmatmul.f32.vlgmr.msrb.gmra.mxu0 %v956_v21  ;;  %1064 = vmatmul.f32.vlgmr.msrb.gmra.mxu1 %v957_v22 }
 0x3df   : > { %1084 = vmatmul.f32.vlgmr.msrb.gmra.mxu2 %v956_v21  ;;  %1104 = vmatmul.f32.vlgmr.msrb.gmra.mxu3 %v957_v22 }
 0x45b   : > { %v1045_v24 = vpop.f32.mrf.mxu0  ;;  %v1065_v26 = vpop.f32.mrf.mxu1 }
 0x45c   : > { %v1046_v25 = vadd.f32 %v1045_v24, %v1024_v23 }
 0x45e   : > { %v1066_v49 = vadd.f32 %v1065_v26, %v1046_v25 }
 0x460   : > { %1108 = vst [vmem:[%s248_s11] sm:$0xff] %v1066_v49 }
 0x462   : > { %v1085_v28 = vpop.f32.mrf.mxu2  ;;  %v1105_v30 = vpop.f32.mrf.mxu3 }
 0x463   : > { %v1086_v29 = vadd.f32 %v1085_v28, %v1025_v27 }
 0x465   : > { %v1106_v31 = vadd.f32 %v1105_v30, %v1086_v29 }
 0x467   : > { %1109 = vst [vmem:[%s248_s11 + $0x8] sm:$0xff] %v1106_v31 }
 0x468   : > { %1458 = shalt.err (!%p1455_p9)
}
 0x469   : > { %1258 = dma.vmem_to_hbm [thread:$0]  (%p1604_p4), %s1125_s12, 256, %s1127_s25, %s1111_s22  }
 0x46a PF: > { %s1138_s20 = sand.u32 1, %s1489_s15   ;;  %p1751_p10 = scmp.ge.s32.totalorder %s1501_s18, 2 }
 0x46b   : > { %s1139_s19 = scalar_lea.sflag [#allocation4], %s1138_s20 }
 0x46c   : > { %p1272_p13 = pnand %p1751_p10, %p1608_p6 }
 0x46e   : > { %p1273_p11 = pneg %p1272_p13 }
 0x470   : > { %1484 = dma.done.wait (%p1273_p11), %s1139_s19, 256  }
 0x471   : > { %1486 = vsyncadd (%p1273_p11), %s1139_s19, 4294967040  ;;  %p18_p0 = scmp.ge.s32.totalorder %s1578_s10, 4   ;;  %s1752_s15 = smov %s1493_s16 }
 0x472   : > { %s1753_s16 = smov %s1497_s17  ;;  %s1754_s17 = smov %s1589_s13 }
 0x473   : > { %s1755_s18 = smov %s1578_s10  ;;  %20 = sbr.rel (!%p18_p0) target bundleno = 6 (0x6), region = 89 }
 0x478   :  { %1145 = vsyncpa [#allocation3], 1 }
 0x479   :  { %1147 = vsyncpa [#allocation3 + $0x1], 1 }
 0x47a   :  { %1148 = vsyncpa [#allocation6], 1 }
 0x47b   :  { %1149 = vsyncpa [#allocation4], 1 }
 0x47c   :  { %1151 = vsyncpa [#allocation4 + $0x1], 1 }

</bundles_post_ra>
